<compile_context>
chip_gen: v6e
topology: v6e:2x2x1
jax: 0.10.0
libtpu: 0.0.40
codegen_flags: <defaults>
</compile_context>

<pallas_src>
import jax
import jax.numpy as jnp
from jax import lax
from jax.experimental import pallas as pl
from jax.experimental.pallas import tpu as pltpu


# --------------------------------------------------------------------------
# Tiling choice: reduction tile TK as large as divides n_pad, row tile TM
# kept small enough that there are >= 2 row tiles (v7x megacore).
# --------------------------------------------------------------------------
def _choose_tiles(n):
    n_pad = pl.cdiv(n, 128) * 128
    if n_pad % 512 == 0:
        tk = 512
    elif n_pad % 256 == 0:
        tk = 256
    else:
        tk = 128
    tm = 256 if (n_pad % 256 == 0 and n_pad // 256 >= 2) else 128
    return n_pad, tm, tk


def prepare_adjacency(a_hat, n_pad):
    """Pad to [n_pad, n_pad] and cast to bf16.  Hoisted: call once per graph."""
    n = a_hat.shape[0]
    pad = n_pad - n
    return jnp.pad(a_hat, ((0, pad), (0, pad))).astype(jnp.bfloat16)


# --------------------------------------------------------------------------
# Kernel 1:  hw = relu(A_hat @ (X W1) + b1) @ W2        (grid: rows x K)
#   xw1 is VMEM-resident; A_hat streams in (TM, TK) bf16 tiles.
# --------------------------------------------------------------------------
def _gcn1_kernel(a_hat_ref, xw1_ref, b1_ref, w2_ref, hw_ref, acc_ref):
    k = pl.program_id(1)
    tk = a_hat_ref.shape[1]

    @pl.when(k == 0)
    def _():
        acc_ref[...] = jnp.zeros_like(acc_ref)

    col0 = pl.multiple_of(k * tk, 128)
    acc_ref[...] += jnp.dot(a_hat_ref[...], xw1_ref[pl.ds(col0, tk), :],
                            preferred_element_type=jnp.float32)

    @pl.when(k == pl.num_programs(1) - 1)
    def _():
        h1 = jnp.maximum(acc_ref[...] + b1_ref[...], 0.0)      # [TM, HID] f32
        # dropout (eval / training=False) -> identity.
        hw = jnp.dot(h1, w2_ref[...], preferred_element_type=jnp.float32)
        hw_ref[...] = hw.astype(hw_ref.dtype)


# --------------------------------------------------------------------------
# Kernel 2:  h2 = A_hat @ hw + b2 ;  score = cos_sim(h2, normalized aux)
#   hw is VMEM-resident; A_hat streams in (TM, TK) bf16 tiles.
# --------------------------------------------------------------------------
def _gcn2_kernel(a_hat_ref, hw_ref, b2_ref, aux_ref, h2_ref, score_ref,
                 acc_ref):
    k = pl.program_id(1)
    tk = a_hat_ref.shape[1]

    @pl.when(k == 0)
    def _():
        acc_ref[...] = jnp.zeros_like(acc_ref)

    col0 = pl.multiple_of(k * tk, 128)
    acc_ref[...] += jnp.dot(a_hat_ref[...], hw_ref[pl.ds(col0, tk), :],
                            preferred_element_type=jnp.float32)

    @pl.when(k == pl.num_programs(1) - 1)
    def _():
        h2 = acc_ref[...] + b2_ref[...]                        # [TM, HID] f32
        h2_ref[...] = h2.astype(h2_ref.dtype)
        numer = jnp.sum(h2 * aux_ref[...], axis=-1, keepdims=True)
        sq = jnp.sum(h2 * h2, axis=-1, keepdims=True)
        # 1/max(||h||,1e-8) == rsqrt(max(||h||^2,1e-16))  (rides the EUP)
        score_ref[...] = numer * lax.rsqrt(jnp.maximum(sq, 1e-16))


# --------------------------------------------------------------------------
# Kernel 3: streamed kernel-smoothing aggregate + classifier.
#   z_i = sum_j kappa_ij h_j / sum_j kappa_ij ; out = h @ Wc_h + z @ Wc_z + bc
#   h2 is VMEM-resident (used for both row and column slices); score columns
#   arrive lane-major (1, TK); padded columns carry a poisoned score so kappa
#   underflows to exactly 0 (no per-tile mask).
# --------------------------------------------------------------------------
def _agg_clf_kernel(sig_ref, h2_ref, s_row_ref, s_col_ref,
                    wch_ref, wcz_ref, bc_ref, out_ref, znum_ref, ksum_ref):
    i = pl.program_id(0)
    k = pl.program_id(1)
    tm = znum_ref.shape[0]
    tk = s_col_ref.shape[1]

    @pl.when(k == 0)
    def _():
        znum_ref[...] = jnp.zeros_like(znum_ref)
        ksum_ref[...] = jnp.zeros_like(ksum_ref)

    inv_sig_sq = sig_ref[0, 0]
    # diff[r, c] = s[col c] - s[row r]  (matches the reference convention)
    diff = s_col_ref[...] - s_row_ref[...]                     # [TM, TK] f32
    kappa = jnp.exp(-(diff * diff) * inv_sig_sq)               # pad cols -> 0

    col0 = pl.multiple_of(k * tk, 128)
    h2_col = h2_ref[pl.ds(col0, tk), :]                        # [TK, HID] bf16

    ksum_ref[...] += jnp.sum(kappa, axis=-1, keepdims=True)
    znum_ref[...] += jnp.dot(kappa.astype(h2_col.dtype), h2_col,
                             preferred_element_type=jnp.float32)

    @pl.when(k == pl.num_programs(1) - 1)
    def _():
        z = znum_ref[...] * pl.reciprocal(ksum_ref[...], approx=True)
        row0 = pl.multiple_of(i * tm, 128)
        h2_row = h2_ref[pl.ds(row0, tm), :].astype(jnp.float32)
        out = (jnp.dot(h2_row, wch_ref[...], preferred_element_type=jnp.float32)
               + jnp.dot(z, wcz_ref[...], preferred_element_type=jnp.float32)
               + bc_ref[...])
        out_ref[...] = out.astype(out_ref.dtype)


# --------------------------------------------------------------------------
# Wrapper
# --------------------------------------------------------------------------
def local_model_forward(x, a_hat_bf, params, sigma):
    n, _ = x.shape
    hid = params["w1"].shape[-1]
    num_cls = params["wc"].shape[-1]

    n_pad, tm, tk = _choose_tiles(n)
    assert a_hat_bf.shape == (n_pad, n_pad) and a_hat_bf.dtype == jnp.bfloat16
    pad = n_pad - n
    grid = (n_pad // tm, n_pad // tk)

    # Tiny hoisted precomputations (XLA glue).
    xw1 = jnp.pad(x @ params["w1"], ((0, pad), (0, 0))).astype(jnp.bfloat16)
    aux = params["aux"].reshape(1, hid)
    aux_n = aux / jnp.maximum(jnp.sqrt(jnp.sum(aux * aux)), 1e-12)

    # Lane-dense classifier: pad num_cls -> 128 lanes, slice afterwards.
    cpad = max(128, pl.cdiv(num_cls, 128) * 128)
    wc_h = jnp.pad(params["wc"][:hid], ((0, 0), (0, cpad - num_cls)))
    wc_z = jnp.pad(params["wc"][hid:], ((0, 0), (0, cpad - num_cls)))
    bc_p = jnp.pad(params["bc"].reshape(1, -1), ((0, 0), (0, cpad - num_cls)))

    cparams = pltpu.CompilerParams(
        dimension_semantics=("parallel", "arbitrary"),
        vmem_limit_bytes=48 * 1024 * 1024,   # within v5e/v6e/v7x physical VMEM
    )

    def row_spec(shape):
        return pl.BlockSpec(shape, lambda i, k: (i, 0))

    def resident(shape):   # constant block index -> VMEM-resident, no re-DMA
        return pl.BlockSpec(shape, lambda i, k: (0, 0))

    ahat_spec = pl.BlockSpec((tm, tk), lambda i, k: (i, k))
    smem_spec = pl.BlockSpec(memory_space=pltpu.MemorySpace.SMEM)

    # ---- kernel 1: hw = relu(A_hat @ XW1 + b1) @ W2 ------------------------
    hw = pl.pallas_call(
        _gcn1_kernel,
        out_shape=jax.ShapeDtypeStruct((n_pad, hid), jnp.bfloat16),
        grid=grid,
        in_specs=[
            ahat_spec,                                  # A_hat tile [tm, tk]
            resident((n_pad, hid)),                     # XW1 (resident)
            resident((1, hid)),                         # b1
            resident((hid, hid)),                       # W2
        ],
        out_specs=row_spec((tm, hid)),
        scratch_shapes=[pltpu.VMEM((tm, hid), jnp.float32)],
        compiler_params=cparams,
    )(a_hat_bf, xw1, params["b1"], params["w2"])

    # ---- kernel 2: h2 = A_hat @ hw + b2 ; cosine score ---------------------
    h2, score = pl.pallas_call(
        _gcn2_kernel,
        out_shape=(jax.ShapeDtypeStruct((n_pad, hid), jnp.bfloat16),
                   jax.ShapeDtypeStruct((n_pad, 1), jnp.float32)),
        grid=grid,
        in_specs=[
            ahat_spec,                                  # A_hat tile [tm, tk]
            resident((n_pad, hid)),                     # hw (resident)
            resident((1, hid)),                         # b2
            resident((1, hid)),                         # normalized aux
        ],
        out_specs=(row_spec((tm, hid)), row_spec((tm, 1))),
        scratch_shapes=[pltpu.VMEM((tm, hid), jnp.float32)],
        compiler_params=cparams,
    )(a_hat_bf, hw, params["b2"], aux_n)

    # Lane-major copy of the scores so kappa column tiles arrive [1, TK].
    # Poison the padded tail (large finite value) so exp underflows to exactly
    # 0 for padded columns -- removes the per-tile iota/compare/where mask.
    score_col = score.reshape(1, n_pad)
    if pad:
        score_col = score_col.at[:, n:].set(1e9)

    inv_sig_sq = jnp.full((1, 1), 1.0 / (float(sigma) ** 2), jnp.float32)

    # ---- kernel 3: streamed kappa aggregate + classifier -------------------
    out = pl.pallas_call(
        _agg_clf_kernel,
        out_shape=jax.ShapeDtypeStruct((n_pad, cpad), jnp.float32),
        grid=grid,
        in_specs=[
            smem_spec,                                  # 1/sigma^2 (SMEM)
            resident((n_pad, hid)),                     # h2 (rows+cols, resident)
            row_spec((tm, 1)),                          # score (rows)
            pl.BlockSpec((1, tk), lambda i, k: (0, k)), # score (cols, lane-major)
            resident((hid, cpad)),                      # Wc (h half, padded)
            resident((hid, cpad)),                      # Wc (z half, padded)
            resident((1, cpad)),                        # bc (padded)
        ],
        out_specs=row_spec((tm, cpad)),
        scratch_shapes=[pltpu.VMEM((tm, hid), jnp.float32),
                        pltpu.VMEM((tm, 1), jnp.float32)],
        compiler_params=cparams,
    )(inv_sig_sq, h2, score, score_col, wc_h, wc_z, bc_p)

    return out[:n, :num_cls]


# --------------------------------------------------------------------------
# Pure-JAX reference (f32) matching the PyTorch semantics (eval mode)
# --------------------------------------------------------------------------
def _reference_forward(x, a_hat, params, sigma):
    h = jnp.maximum(a_hat @ x @ params["w1"] + params["b1"], 0.0)
    h = a_hat @ h @ params["w2"] + params["b2"]
    aux = params["aux"][0]
    a = aux / jnp.maximum(jnp.linalg.norm(aux), 1e-12)
    score = (h @ a) / jnp.maximum(jnp.linalg.norm(h, axis=-1), 1e-8)
    diff = score[None, :] - score[:, None]
    kappa = jnp.exp(-diff ** 2 / sigma ** 2)
    z = (kappa @ h) / jnp.sum(kappa, axis=1, keepdims=True)
    return jnp.concatenate([h, z], axis=-1) @ params["wc"] + params["bc"]


def _build_graph_norm_adj(n):
    """Ring graph with self-loops, symmetric GCN normalization."""
    src = jnp.arange(n)
    dst = (src + 1) % n
    edge_index = jnp.stack([jnp.concatenate([src, dst]),
                            jnp.concatenate([dst, src])])          # [2, 2N]
    adj = jnp.zeros((n, n), jnp.float32).at[edge_index[0], edge_index[1]].set(1.0)
    adj = adj + jnp.eye(n, dtype=jnp.float32)                      # self-loops
    deg = jnp.sum(adj, axis=1)
    d_inv_sqrt = 1.0 / jnp.sqrt(deg)
    a_hat = adj * d_inv_sqrt[:, None] * d_inv_sqrt[None, :]
    return edge_index, a_hat


if __name__ == "__main__":
    # Small config; N not a multiple of the tile to exercise padding/poisoning.
    N, NUM_FEATS, HID, NUM_CLS = 200, 8, 32, 4
    ANCHOR_DIM = HID
    SIGMA = 1.0

    key = jax.random.PRNGKey(0)
    kx, k1, k2, k3, k4, k5, k6, k7 = jax.random.split(key, 8)

    x = jax.random.normal(kx, (N, NUM_FEATS), jnp.float32)
    edge_index, a_hat = _build_graph_norm_adj(N)

    params = {
        "w1": jax.random.normal(k1, (NUM_FEATS, HID), jnp.float32) * 0.2,
        "b1": jax.random.normal(k2, (1, HID), jnp.float32) * 0.05,
        "w2": jax.random.normal(k3, (HID, HID), jnp.float32) * 0.2,
        "b2": jax.random.normal(k4, (1, HID), jnp.float32) * 0.05,
        "aux": jax.random.normal(k5, (1, ANCHOR_DIM), jnp.float32),
        "wc": jax.random.normal(k6, (2 * HID, NUM_CLS), jnp.float32) * 0.1,
        "bc": jax.random.normal(k7, (1, NUM_CLS), jnp.float32) * 0.05,
    }

    # Hoisted (once per graph): pad + bf16-cast the normalized adjacency.
    n_pad, _, _ = _choose_tiles(N)
    a_hat_bf = prepare_adjacency(a_hat, n_pad)

    out = local_model_forward(x, a_hat_bf, params, SIGMA)
    out = jax.block_until_ready(out)

    ref = _reference_forward(x, a_hat, params, SIGMA)
    assert out.shape == (N, NUM_CLS)
    max_err = float(jnp.max(jnp.abs(out - ref)))
    # bf16 MXU operands (f32 accumulation) -> loosened tolerance vs f32 ref.
    assert jnp.allclose(out, ref, atol=5e-2, rtol=5e-2), (
        f"mismatch vs reference, max abs err = {max_err}")

    print("KERNEL_OK")
</pallas_src>

<mosaic_0001>
module attributes {stable_mosaic.version = 11 : i64} {
  func.func @_gcn1_kernel(%arg0: i32, %arg1: i32, %arg2: memref<128x256xbf16, #tpu.memory_space<vmem>>, %arg3: memref<256x32xbf16, #tpu.memory_space<vmem>>, %arg4: memref<1x32xf32, #tpu.memory_space<vmem>>, %arg5: memref<32x32xf32, #tpu.memory_space<vmem>>, %arg6: memref<128x32xbf16, #tpu.memory_space<vmem>>, %arg7: memref<128x32xf32, #tpu.memory_space<vmem>>) attributes {dimension_semantics = [#tpu.dimension_semantics<parallel>, #tpu.dimension_semantics<arbitrary>], iteration_bounds = array<i64: 2, 1>, scalar_prefetch = 0 : i64, scratch_operands = 1 : i64, tpu.core_type = #tpu.core_type<tc>, window_params = [{transform_indices = @transform_0, window_bounds = array<i64: 128, 256>}, {pipeline_mode = #tpu.pipeline_mode<synchronous>, transform_indices = @transform_1, window_bounds = array<i64: 256, 32>}, {pipeline_mode = #tpu.pipeline_mode<synchronous>, transform_indices = @transform_2, window_bounds = array<i64: 1, 32>}, {pipeline_mode = #tpu.pipeline_mode<synchronous>, transform_indices = @transform_3, window_bounds = array<i64: 32, 32>}, {transform_indices = @transform_4, window_bounds = array<i64: 128, 32>}]} {
    %c0_i32 = arith.constant 0 : i32
    %0 = arith.cmpi eq, %arg1, %c0_i32 : i32
    %1 = arith.extui %0 : i1 to i32
    %c0_i32_0 = arith.constant 0 : i32
    %2 = arith.cmpi ne, %1, %c0_i32_0 : i32
    scf.if %2 {
      %cst_9 = arith.constant 0.000000e+00 : f32
      %15 = vector.broadcast %cst_9 : f32 to vector<128x32xf32>
      %c0_10 = arith.constant 0 : index
      %c0_11 = arith.constant 0 : index
      %16 = vector.load %arg7[%c0_10, %c0_11] : memref<128x32xf32, #tpu.memory_space<vmem>>, vector<128x32xf32>
      tpu.vector_store %arg7[%c0_10, %c0_11], %15 {strides = array<i32>} : memref<128x32xf32, #tpu.memory_space<vmem>>, vector<128x32xf32>,
    } else {
    }
    %c256_i32 = arith.constant 256 : i32
    %3 = arith.muli %arg1, %c256_i32 : i32
    %4 = tpu.assume_multiple %3, 128 : i32
    %c0 = arith.constant 0 : index
    %c0_1 = arith.constant 0 : index
    %5 = vector.load %arg7[%c0, %c0_1] : memref<128x32xf32, #tpu.memory_space<vmem>>, vector<128x32xf32>
    %c0_2 = arith.constant 0 : index
    %c0_3 = arith.constant 0 : index
    %6 = vector.load %arg2[%c0_2, %c0_3] : memref<128x256xbf16, #tpu.memory_space<vmem>>, vector<128x256xbf16>
    %7 = arith.index_cast %4 : i32 to index
    %c0_4 = arith.constant 0 : index
    %8 = vector.load %arg3[%7, %c0_4] : memref<256x32xbf16, #tpu.memory_space<vmem>>, vector<256x32xbf16>
    %cst = arith.constant dense<0.000000e+00> : vector<128x32xf32>
    %9 = tpu.matmul %6, %8, %cst {dimension_numbers = #tpu.dot_dimension_numbers<[1], [0], [0], [1], [0, 0, 1, 1], [], []>} : vector<128x256xbf16>, vector<256x32xbf16>, vector<128x32xf32> -> vector<128x32xf32>
    %10 = arith.addf %5, %9 : vector<128x32xf32>
    %c0_5 = arith.constant 0 : index
    %c0_6 = arith.constant 0 : index
    %11 = vector.load %arg7[%c0_5, %c0_6] : memref<128x32xf32, #tpu.memory_space<vmem>>, vector<128x32xf32>
    tpu.vector_store %arg7[%c0_5, %c0_6], %10 {strides = array<i32>} : memref<128x32xf32, #tpu.memory_space<vmem>>, vector<128x32xf32>,
    %c0_i32_7 = arith.constant 0 : i32
    %12 = arith.cmpi eq, %arg1, %c0_i32_7 : i32
    %13 = arith.extui %12 : i1 to i32
    %c0_i32_8 = arith.constant 0 : i32
    %14 = arith.cmpi ne, %13, %c0_i32_8 : i32
    scf.if %14 {
      %c0_9 = arith.constant 0 : index
      %c0_10 = arith.constant 0 : index
      %15 = vector.load %arg7[%c0_9, %c0_10] : memref<128x32xf32, #tpu.memory_space<vmem>>, vector<128x32xf32>
      %c0_11 = arith.constant 0 : index
      %c0_12 = arith.constant 0 : index
      %16 = vector.load %arg4[%c0_11, %c0_12] : memref<1x32xf32, #tpu.memory_space<vmem>>, vector<1x32xf32>
      %17 = vector.broadcast %16 : vector<1x32xf32> to vector<128x32xf32>
      %18 = arith.addf %15, %17 : vector<128x32xf32>
      %cst_13 = arith.constant 0.000000e+00 : f32
      %19 = vector.broadcast %cst_13 : f32 to vector<128x32xf32>
      %20 = arith.maximumf %18, %19 : vector<128x32xf32>
      %c0_14 = arith.constant 0 : index
      %c0_15 = arith.constant 0 : index
      %21 = vector.load %arg5[%c0_14, %c0_15] : memref<32x32xf32, #tpu.memory_space<vmem>>, vector<32x32xf32>
      %cst_16 = arith.constant dense<0.000000e+00> : vector<128x32xf32>
      %22 = tpu.matmul %20, %21, %cst_16 {dimension_numbers = #tpu.dot_dimension_numbers<[1], [0], [0], [1], [0, 0, 1, 1], [], []>} : vector<128x32xf32>, vector<32x32xf32>, vector<128x32xf32> -> vector<128x32xf32>
      %23 = arith.truncf %22 : vector<128x32xf32> to vector<128x32xbf16>
      %c0_17 = arith.constant 0 : index
      %c0_18 = arith.constant 0 : index
      %24 = vector.load %arg6[%c0_17, %c0_18] : memref<128x32xbf16, #tpu.memory_space<vmem>>, vector<128x32xbf16>
      tpu.vector_store %arg6[%c0_17, %c0_18], %23 {strides = array<i32>} : memref<128x32xbf16, #tpu.memory_space<vmem>>, vector<128x32xbf16>,
    } else {
    }
    return
  }
  func.func @transform_0(%arg0: i32, %arg1: i32) -> (i32, i32) {
    %c0_i32 = arith.constant 0 : i32
    return %arg0, %arg1 : i32, i32
  }
  func.func @transform_1(%arg0: i32, %arg1: i32) -> (i32, i32) {
    %c0_i32 = arith.constant 0 : i32
    %c0_i32_0 = arith.constant 0 : i32
    %c0_i32_1 = arith.constant 0 : i32
    return %c0_i32, %c0_i32_0 : i32, i32
  }
  func.func @transform_2(%arg0: i32, %arg1: i32) -> (i32, i32) {
    %c0_i32 = arith.constant 0 : i32
    %c0_i32_0 = arith.constant 0 : i32
    %c0_i32_1 = arith.constant 0 : i32
    return %c0_i32, %c0_i32_0 : i32, i32
  }
  func.func @transform_3(%arg0: i32, %arg1: i32) -> (i32, i32) {
    %c0_i32 = arith.constant 0 : i32
    %c0_i32_0 = arith.constant 0 : i32
    %c0_i32_1 = arith.constant 0 : i32
    return %c0_i32, %c0_i32_0 : i32, i32
  }
  func.func @transform_4(%arg0: i32, %arg1: i32) -> (i32, i32) {
    %c0_i32 = arith.constant 0 : i32
    %c0_i32_0 = arith.constant 0 : i32
    return %arg0, %c0_i32 : i32, i32
  }
}

</mosaic_0001>

<bundles_post_ra>
// kernel: tpu_custom_call.1
= control target key start
LH: loop header
LB: loop body
LE: loop exit
PB: predicated region body
PF: predicated region fallthrough
CT: control target
= control target key end

     0   :  { %9 = vsyncpa [#allocation4], 0  ;;  %s1764_s0 = inlined_call_operand.hbm [shape: bf16[256,256], index: 0, kind: input, shape index: {}]   ;;  %s1765_s1 = inlined_call_operand.vmem [shape: bf16[256,32], index: 1, kind: input, shape index: {}]   ;;  %s1766_s2 = inlined_call_operand.vmem [shape: f32[1,32], index: 2, kind: input, shape index: {}]   ;;  %s1767_s3 = inlined_call_operand.vmem [shape: f32[32,32], index: 3, kind: input, shape index: {}]   ;;  %s1768_s4 = inlined_call_operand.vmem [shape: bf16[256,32], index: 4, kind: output, shape index: {}]  }
   0x1   :  { %11 = vsyncpa [#allocation4 + $0x1], 0  ;;  %s1488_s15 = smov 0   ;;  %s1490_s16 = smov 0  }
   0x2   :  { %s1492_s17 = smov 0   ;;  %s1494_s18 = smov 0  }
   0x3   :  { %s1496_s19 = smov 0   ;;  %s1498_s20 = smov 0  }
   0x4 LB: > { %s1052_s21 = sadd.s32 4294967295, %s1457_s20   ;;  %s29_s22 = sadd.s32 1, %s1453_s19  ;;  %s1457_s20 = sphi %s1498_s20, %s17_s20   ;;  %s1453_s19 = sphi %s1496_s19, %s1776_s19   ;;  %s1449_s18 = sphi %s1494_s18, %s1775_s18   ;;  %s1445_s17 = sphi %s1492_s17, %s1774_s17   ;;  %s1441_s16 = sphi %s1490_s16, %s1773_s16   ;;  %s1437_s15 = sphi %s1488_s15, %s1772_s15  }
   0x5   : > { %p31_p0 = scmp.ge.s32.totalorder %s29_s22, 2  ;;  %s38_s23 = sadd.s32 1, %s1445_s17 }
   0x6   : > { %p45_p1 = scmp.ne.s32.totalorder %s1445_s17, %s1441_s16  ;;  %p46_p2 = scmp.eq.s32.totalorder %s1457_s20, 0 }
   0x7   : > { %s1778_s22 = smov (%p31_p0, %s29_s22), 0  ;;  %p51_p4 = scmp.ne.s32.totalorder %s1441_s16, %s1437_s15 }
   0x8   : > { %p1524_p3 = por %p46_p2, %p45_p1  ;;  %s33_s25 = ssub.s32 %s1453_s19, %s1778_s22 }
   0x9   : > { %p52_p5 = scmp.eq.s32.totalorder %s1052_s21, 0  ;;  %p36_p6 = scmp.eq.s32.totalorder %s33_s25, 0 }
   0xa   : > { %p1287_p8 = scmp.lt.s32.totalorder %s1457_s20, 2  ;;  %s173_s28 = sand.u32 1, %s1445_s17  }
   0xb   : > { %p1531_p7 = por %p52_p5, %p51_p4  ;;  %s1132_s29 = sshll.u32 %s1453_s19, 11 }
   0xc   : > { %s1537_s27 = scalar_select %p36_p6, %s1445_s17, %s38_s23  }
   0xd   : > { %s1056_s30 = sshll.u32 %s173_s28, 7  ;;  %s186_s7 = scalar_lea.hbm %s1764_s0, %s1132_s29 }
   0xe   : > { %s177_s8 = scalar_lea.vmem [#allocation3], %s1056_s30  ;;  %p1546_p9 = pnand %p1287_p8, %p1524_p3 }
   0xf   : > { %s187_s9 = sshll.u32 %s177_s8, 4  ;;  %s174_s11 = scalar_lea.sflag [#allocation4], %s173_s28  ;;  %s188_s9 = int_to_ptr.vmem [resolvable:$true] %s187_s9 }
  0x10   : > { %p1381_p10 = pneg %p1546_p9  ;;  %s1392_s12 = scalar_lea.vmem %s188_s9, 2048 }
  0x11   : > { %p1393_p11 = scmp.ne.s32.totalorder %s188_s9, %s1392_s12  ;;  %s1459_s13 = smov [#allocation3]  }
  0x12   : > { %s1397_s14 = sshll.u32 %s1459_s13, 4  ;;  %s1398_s14 = int_to_ptr.vmem [resolvable:$false] %s1397_s14 }
  0x13   : > { %p1395_p12 = pnand %p1393_p11, %p1381_p10  ;;  %s1399_s15 = scalar_lea.vmem %s1398_s14, 4096 }
  0x14   : > { %p1400_p0 = scmp.lt.s32.totalorder %s188_s9, %s1398_s14  ;;  %p1401_p1 = scmp.lt.s32.totalorder %s1399_s15, %s1392_s12 }
  0x15   : > { %p1396_p13 = pneg %p1395_p12 }
  0x16   : > { %p1402_p2 = por %p1401_p1, %p1400_p0 }
  0x18   : > { %p1403_p3 = pnand %p1402_p2, %p1396_p13 }
  0x1a   : > { %1406 = shalt.err (!%p1403_p3)
}
  0x1b   : > { %s1460_s21 = smov 128   ;;  %s1461_s23 = smov 8  }
  0x1c   : > { %1286 = dma.hbm_to_vmem [thread:$0]  (!%p1546_p9), %s186_s7, 2048, %s188_s9, %s174_s11, %s1460_s21, %s1460_s21, %s1461_s23  }
  0x1d   : > { %p1060_p4 = scmp.ge.s32.totalorder %s1457_s20, 1  ;;  %p195_p5 = scmp.lt.s32.totalorder %s1457_s20, 3 }
  0x1f   : > { %p196_p6 = pnand %p1060_p4, %p195_p5 }
  0x20   : > { %s201_s24 = sand.u32 (!%p196_p6), 1, %s1441_s16  }
  0x21   : > { %199 = sbr.rel (%p196_p6) target bundleno = 533 (0x215), region = 36  ;;  %s1061_s25 = sshll.u32 (!%p196_p6), %s201_s24, 7 }
  0x22   : > { %s202_s28 = scalar_lea.sflag (!%p196_p6), [#allocation4], %s201_s24  ;;  %s1557_s29 = scalar_lea.vmem (!%p196_p6), [#allocation3], %s1061_s25 }
  0x26   : > { %1432 = dma.done.wait (%p1531_p7), %s202_s28, 2048  }
  0x27   : > { %1434 = vsyncadd (%p1531_p7), %s202_s28, 4294965248  ;;  %v1339_v0 = vld [vmem:[%s1765_s1 + $0x78] sm:$0xff]   ;;  %v1341_v2 = vld [vmem:[%s1765_s1 + $0x70] sm:$0xff]   ;;  %vm243_vm0 = vcmask 261120   ;;  %v1462_v32 = vmov 0.0   ;;  %s1062_s9 = sshll.u32 %s1449_s18, 4 }
  0x28   : > { %v1340_v1 = vld [vmem:[%s1765_s1 + $0x38] sm:$0xff]   ;;  %1149 = vmatprep.subr.bf16.mxu0 %v1339_v0  ;;  %1265 = vmatprep.subr.bf16.mxu1 %v1339_v0  ;;  %v1342_v3 = vld [vmem:[%s1765_s1 + $0x30] sm:$0xff]   ;;  %v1343_v4 = vld [vmem:[%s1765_s1 + $0x68] sm:$0xff]   ;;  %244 = vst.msk [vmem:[#allocation2] sm:$0xff] %vm243_vm0, %v1462_v32  ;;  %p233_p7 = scmp.lt.s32.totalorder %s1062_s9, 31  ;;  %vm954_vm1 = vcmask 257024  }
  0x29   : > { %1150 = vmatpush3.bf16.msra.mxu0 %v1340_v1  ;;  %1273 = vmatpush3.bf16.msra.mxu1 %v1340_v1  ;;  %v1344_v5 = vld [vmem:[%s1765_s1 + $0x28] sm:$0xff]   ;;  %v1345_v6 = vld [vmem:[%s1765_s1 + $0x60] sm:$0xff]   ;;  %v1347_v8 = vld [vmem:[%s1765_s1 + $0x58] sm:$0xff]   ;;  %245 = vst.msk [vmem:[#allocation2 + $0x8] sm:$0xff] %vm243_vm0, %v1462_v32 }
  0x2a   : > { %1151 = vmatprep.subr.bf16.mxu0 %v1341_v2  ;;  %1266 = vmatprep.subr.bf16.mxu1 %v1341_v2  ;;  %v1346_v7 = vld [vmem:[%s1765_s1 + $0x20] sm:$0xff]   ;;  %v1348_v9 = vld [vmem:[%s1765_s1 + $0x18] sm:$0xff]   ;;  %v1349_v10 = vld [vmem:[%s1765_s1 + $0x50] sm:$0xff]   ;;  %246 = vst.msk [vmem:[#allocation2 + $0x10] sm:$0xff] %vm243_vm0, %v1462_v32  ;;  %s1780_s9 = smov (!%p233_p7, %s1062_s9), 31 }
  0x2b   : > { %v1357_v11 = vld [vmem:[%s1557_s29 + $0x4] ss:$8 sps:$4 sm:$0xff]   ;;  %v1350_v12 = vld [vmem:[%s1765_s1 + $0x10] sm:$0xff]   ;;  %v1355_v18 = vld [vmem:[%s1557_s29] ss:$8 sps:$4 sm:$0xff]   ;;  %247 = vst.msk [vmem:[#allocation2 + $0x18] sm:$0xff] %vm243_vm0, %v1462_v32 }
  0x2c   : > { %537 = vmatprep.mubr.bf16.mxu0 %v1357_v11  ;;  %v1351_v13 = vld [vmem:[%s1765_s1 + $0x48] sm:$0xff]   ;;  %v1353_v16 = vld [vmem:[%s1765_s1 + $0x40] sm:$0xff]   ;;  %v1358_v19 = vld [vmem:[%s1557_s29 + $0x14] ss:$8 sps:$4 sm:$0xff]   ;;  %248 = vst.msk [vmem:[#allocation2 + $0x20] sm:$0xff] %vm243_vm0, %v1462_v32  ;;  %s1063_s10 = sshll.u32 %s1780_s9, 2 }
  0x2d   : > { %1152 = vmatpush3.bf16.msra.mxu0 %v1342_v3  ;;  %1274 = vmatpush3.bf16.msra.mxu1 %v1342_v3  ;;  %v1352_v14 = vld [vmem:[%s1765_s1 + $0x8] sm:$0xff]   ;;  %v1354_v17 = vld [vmem:[%s1765_s1] sm:$0xff]   ;;  %v1376_v21 = vld [vmem:[%s1557_s29 + $0x74] ss:$8 sps:$4 sm:$0xff]   ;;  %249 = vst.msk [vmem:[#allocation2 + $0x28] sm:$0xff] %vm243_vm0, %v1462_v32  ;;  %s1712_s12 = scalar_lea.vmem %s1768_s4, %s1063_s10 }
  0x2e   : > { %1153 = vmatprep.subr.bf16.mxu0 %v1343_v4  ;;  %1267 = vmatprep.subr.bf16.mxu1 %v1343_v4  ;;  %v1372_v15 = vld [vmem:[%s1557_s29 + $0x64] ss:$8 sps:$4 sm:$0xff]   ;;  %v1370_v20 = vld [vmem:[%s1557_s29 + $0x60] ss:$8 sps:$4 sm:$0xff]   ;;  %v1360_v22 = vld [vmem:[%s1557_s29 + $0x10] ss:$8 sps:$4 sm:$0xff]  }
  0x2f   : > { %585 = vmatprep.mubr.bf16.mxu1 %v1372_v15  ;;  %v1361_v23 = vld [vmem:[%s1557_s29 + $0x24] ss:$8 sps:$4 sm:$0xff]   ;;  %v1378_v24 = vld [vmem:[%s1557_s29 + $0x70] ss:$8 sps:$4 sm:$0xff]   ;;  %v1363_v25 = vld [vmem:[%s1557_s29 + $0x20] ss:$8 sps:$4 sm:$0xff]  }
  0x30   : > { %v1364_v26 = vld [vmem:[%s1557_s29 + $0x34] ss:$8 sps:$4 sm:$0xff]   ;;  %v1366_v27 = vld [vmem:[%s1557_s29 + $0x30] ss:$8 sps:$4 sm:$0xff]   ;;  %v1367_v28 = vld [vmem:[%s1557_s29 + $0x44] ss:$8 sps:$4 sm:$0xff]  }
  0x31   : > { %1154 = vmatpush3.bf16.msra.mxu0 %v1344_v5  ;;  %1275 = vmatpush3.bf16.msra.mxu1 %v1344_v5  ;;  %v1369_v29 = vld [vmem:[%s1557_s29 + $0x40] ss:$8 sps:$4 sm:$0xff]   ;;  %v1373_v30 = vld [vmem:[%s1557_s29 + $0x54] ss:$8 sps:$4 sm:$0xff]   ;;  %v1375_v31 = vld [vmem:[%s1557_s29 + $0x50] ss:$8 sps:$4 sm:$0xff]  }
  0x32   : > { %1155 = vmatprep.subr.bf16.mxu0 %v1345_v6  ;;  %1268 = vmatprep.subr.bf16.mxu1 %v1345_v6  ;;  %250 = vst.msk [vmem:[#allocation2 + $0x30] sm:$0xff] %vm243_vm0, %v1462_v32  ;;  %251 = vst.msk [vmem:[#allocation2 + $0x38] sm:$0xff] %vm243_vm0, %v1462_v32  ;;  %v696_v33 = vld [vmem:[%s1767_s3 + $0x18] sm:$0xff]  ;;  %v695_v34 = vld [vmem:[%s1767_s3 + $0x10] sm:$0xff] }
  0x33   : > { %252 = vst.msk [vmem:[#allocation2 + $0x40] sm:$0xff] %vm243_vm0, %v1462_v32  ;;  %253 = vst.msk [vmem:[#allocation2 + $0x48] sm:$0xff] %vm243_vm0, %v1462_v32  ;;  %v694_v35 = vld [vmem:[%s1767_s3 + $0x8] sm:$0xff]  ;;  %v693_v36 = vld [vmem:[%s1767_s3] sm:$0xff] }
  0x34   : > { %254 = vst.msk [vmem:[#allocation2 + $0x50] sm:$0xff] %vm243_vm0, %v1462_v32  ;;  %255 = vst.msk [vmem:[#allocation2 + $0x58] sm:$0xff] %vm243_vm0, %v1462_v32  ;;  %v261_v39 = vld [vmem:[#allocation2] sm:$0xff]  ;;  %v262_v48 = vld [vmem:[#allocation2 + $0x8] sm:$0xff] }
  0x35   : > { %1156 = vmatpush3.bf16.msra.mxu0 %v1346_v7  ;;  %1276 = vmatpush3.bf16.msra.mxu1 %v1346_v7  ;;  %256 = vst.msk [vmem:[#allocation2 + $0x60] sm:$0xff] %vm243_vm0, %v1462_v32  ;;  %257 = vst.msk [vmem:[#allocation2 + $0x68] sm:$0xff] %vm243_vm0, %v1462_v32  ;;  %v263_v58 = vld [vmem:[#allocation2 + $0x10] sm:$0xff]  ;;  %v1661_v1 = vld [vmem:[%s1766_s2] ss:$0 sm:$0xff] }
  0x36   : > { %1157 = vmatprep.subr.bf16.mxu0 %v1347_v8  ;;  %1269 = vmatprep.subr.bf16.mxu1 %v1347_v8  ;;  %258 = vst.msk [vmem:[#allocation2 + $0x70] sm:$0xff] %vm243_vm0, %v1462_v32  ;;  %259 = vst.msk [vmem:[#allocation2 + $0x78] sm:$0xff] %vm243_vm0, %v1462_v32  ;;  %v264_v5 = vld [vmem:[#allocation2 + $0x18] sm:$0xff] }
  0x39   : > { %1158 = vmatpush3.bf16.msra.mxu0 %v1348_v9  ;;  %1277 = vmatpush3.bf16.msra.mxu1 %v1348_v9 }
  0x3a   : > { %1159 = vmatprep.subr.bf16.mxu0 %v1349_v10  ;;  %1270 = vmatprep.subr.bf16.mxu1 %v1349_v10 }
  0x3c   : > { %v273_v42 = vld [vmem:[#allocation2 + $0x60] sm:$0xff]  ;;  %v274_v52 = vld [vmem:[#allocation2 + $0x68] sm:$0xff] }
  0x3d   : > { %1160 = vmatpush3.bf16.msra.mxu0 %v1350_v12  ;;  %1278 = vmatpush3.bf16.msra.mxu1 %v1350_v12  ;;  %v275_v62 = vld [vmem:[#allocation2 + $0x70] sm:$0xff]  ;;  %v276_v11 = vld [vmem:[#allocation2 + $0x78] sm:$0xff] }
  0x3e   : > { %1161 = vmatprep.subr.bf16.mxu0 %v1351_v13  ;;  %1271 = vmatprep.subr.bf16.mxu1 %v1351_v13 }
  0x41   : > { %1162 = vmatpush3.bf16.msra.mxu0 %v1352_v14  ;;  %1279 = vmatpush3.bf16.msra.mxu1 %v1352_v14 }
  0x42   : > { %1163 = vmatprep.subr.bf16.mxu0 %v1353_v16  ;;  %1272 = vmatprep.subr.bf16.mxu1 %v1353_v16 }
  0x45   : > { %1164 = vmatpush3.bf16.msra.mxu0 %v1354_v17  ;;  %1280 = vmatpush3.bf16.msra.mxu1 %v1354_v17  ;;  %v265_v17 = vld [vmem:[#allocation2 + $0x20] sm:$0xff] }
  0x46   : > { %1233 = vmatprep.subr.mxu1 %v696_v33 }
  0x48   : > { %538 = vmatmul.mubr.bf16.vlgmr.msra.gmra.mxu0 %v1355_v18  ;;  %586 = vmatmul.mubr.bf16.vlgmr.msra.gmra.mxu1 %v1370_v20 }
  0x49   : > { %545 = vmatprep.mubr.bf16.mxu0 %v1358_v19  ;;  %593 = vmatprep.mubr.bf16.mxu1 %v1376_v21 }
  0x4a   : > { %1234 = vmatpush3.msra.mxu1 %v696_v33 }
  0x4b   : > { %1235 = vmatprep.subr.mxu1 %v695_v34 }
  0x4c   : > { %1236 = vmatpush3.msra.mxu1 %v695_v34  ;;  %v267_v34 = vld [vmem:[#allocation2 + $0x30] sm:$0xff] }
  0x4d   : > { %1237 = vmatprep.subr.mxu1 %v694_v35 }
  0x4e   : > { %1238 = vmatpush3.msra.mxu1 %v694_v35 }
  0x4f   : > { %1239 = vmatprep.subr.mxu1 %v693_v36 }
  0x50   : > { %546 = vmatmul.mubr.bf16.gmra.mxu0 %v1360_v22  ;;  %594 = vmatmul.mubr.bf16.gmra.mxu1 %v1378_v24 }
  0x51   : > { %553 = vmatprep.mubr.bf16.mxu0 %v1361_v23  ;;  %1240 = vmatpush3.msra.mxu1 %v693_v36 }
  0x58   : > { %554 = vmatmul.mubr.bf16.gmra.mxu0 %v1363_v25 }
  0x59   : > { %561 = vmatprep.mubr.bf16.mxu0 %v1364_v26  ;;  %v266_v26 = vld [vmem:[#allocation2 + $0x28] sm:$0xff] }
  0x60   : > { %562 = vmatmul.mubr.bf16.gmra.mxu0 %v1366_v27 }
  0x61   : > { %569 = vmatprep.mubr.bf16.mxu0 %v1367_v28 }
  0x68   : > { %570 = vmatmul.mubr.bf16.gmra.mxu0 %v1369_v29 }
  0x69   : > { %577 = vmatprep.mubr.bf16.mxu0 %v1373_v30 }
  0x70   : > { %578 = vmatmul.mubr.bf16.gmra.mxu0 %v1375_v31 }
 0x108   : > { %v1165_v37 = vpop.f32.mrf.mxu0  ;;  %v1201_v38 = vpop.f32.mrf.mxu1 }
 0x10a   : > { %v1166_v40 = vpop.f32.mrf.mxu0  ;;  %v1202_v43 = vpop.f32.mrf.mxu1 }
 0x10b   : > { %v1167_v41 = vadd.f32 %v1166_v40, %v1165_v37  ;;  %v1203_v45 = vadd.f32 %v1202_v43, %v1201_v38 }
 0x10c   : > { %v1168_v44 = vpop.f32.mrf.mxu0  ;;  %v1204_v47 = vpop.f32.mrf.mxu1 }
 0x10d   : > { %v602_v46 = vadd.f32 %v1167_v41, %v261_v39  ;;  %v614_v50 = vadd.f32 %v1203_v45, %v273_v42  ;;  %v268_v42 = vld [vmem:[#allocation2 + $0x38] sm:$0xff] }
 0x10e   : > { %v1169_v49 = vpop.f32.mrf.mxu0  ;;  %v1205_v53 = vpop.f32.mrf.mxu1 }
 0x10f   : > { %619 = vst.msk [vmem:[#allocation2] sm:$0xff] %vm243_vm0, %v602_v46  ;;  %v1170_v51 = vadd.f32 %v1169_v49, %v1168_v44  ;;  %631 = vst.msk [vmem:[#allocation2 + $0x60] sm:$0xff] %vm243_vm0, %v614_v50  ;;  %v1206_v55 = vadd.f32 %v1205_v53, %v1204_v47  ;;  %v269_v50 = vld [vmem:[#allocation2 + $0x40] sm:$0xff] }
 0x110   : > { %v1171_v54 = vpop.f32.mrf.mxu0  ;;  %v1207_v57 = vpop.f32.mrf.mxu1 }
 0x111   : > { %v603_v56 = vadd.f32 %v1170_v51, %v262_v48  ;;  %v615_v60 = vadd.f32 %v1206_v55, %v274_v52 }
 0x112   : > { %v1172_v59 = vpop.f32.mrf.mxu0  ;;  %v1208_v63 = vpop.f32.mrf.mxu1 }
 0x113   : > { %620 = vst.msk [vmem:[#allocation2 + $0x8] sm:$0xff] %vm243_vm0, %v603_v56  ;;  %v1173_v61 = vadd.f32 %v1172_v59, %v1171_v54  ;;  %632 = vst.msk [vmem:[#allocation2 + $0x68] sm:$0xff] %vm243_vm0, %v615_v60  ;;  %v1209_v2 = vadd.f32 %v1208_v63, %v1207_v57 }
 0x114   : > { %v1174_v0 = vpop.f32.mrf.mxu0  ;;  %v1210_v4 = vpop.f32.mrf.mxu1 }
 0x115   : > { %v604_v3 = vadd.f32 %v1173_v61, %v263_v58  ;;  %v616_v8 = vadd.f32 %v1209_v2, %v275_v62  ;;  %v270_v58 = vld [vmem:[#allocation2 + $0x48] sm:$0xff] }
 0x116   : > { %v1175_v6 = vpop.f32.mrf.mxu0  ;;  %v638_v7 = vld [vmem:[#allocation2] sm:$0xff]  ;;  %v1211_v12 = vpop.f32.mrf.mxu1 }
 0x117   : > { %621 = vst.msk [vmem:[#allocation2 + $0x10] sm:$0xff] %vm243_vm0, %v604_v3  ;;  %v1176_v9 = vadd.f32 %v1175_v6, %v1174_v0  ;;  %v661_v10 = vadd.f32 %v1661_v1, %v638_v7  ;;  %633 = vst.msk [vmem:[#allocation2 + $0x70] sm:$0xff] %vm243_vm0, %v616_v8  ;;  %v1212_v14 = vadd.f32 %v1211_v12, %v1210_v4  ;;  %v271_v3 = vld [vmem:[#allocation2 + $0x50] sm:$0xff] }
 0x118   : > { %v1177_v13 = vpop.f32.mrf.mxu0 }
 0x119   : > { %v605_v15 = vadd.f32 %v1176_v9, %v264_v5  ;;  %v677_v16 = vmax.f32 %v661_v10, 0.0  ;;  %v617_v20 = vadd.f32 %v1212_v14, %v276_v11  ;;  %v272_v11 = vld [vmem:[#allocation2 + $0x58] sm:$0xff] }
 0x11a   : > { %v1178_v18 = vpop.f32.mrf.mxu0  ;;  %v639_v19 = vld [vmem:[#allocation2 + $0x8] sm:$0xff] }
 0x11b   : > { %622 = vst.msk [vmem:[#allocation2 + $0x18] sm:$0xff] %vm243_vm0, %v605_v15  ;;  %v1179_v21 = vadd.f32 %v1178_v18, %v1177_v13  ;;  %1241 = vmatprep.mubr.msk.f32.mxu1 %vm243_vm0, %v677_v16  ;;  %v662_v22 = vadd.f32 %v1661_v1, %v639_v19  ;;  %634 = vst.msk [vmem:[#allocation2 + $0x78] sm:$0xff] %vm243_vm0, %v617_v20 }
 0x11c   : > { %v1180_v23 = vpop.f32.mrf.mxu0 }
 0x11d   : > { %v606_v24 = vadd.f32 %v1179_v21, %v265_v17  ;;  %v678_v25 = vmax.f32 %v662_v22, 0.0 }
 0x11e   : > { %v1181_v27 = vpop.f32.mrf.mxu0  ;;  %v640_v28 = vld [vmem:[#allocation2 + $0x10] sm:$0xff] }
 0x11f   : > { %623 = vst.msk [vmem:[#allocation2 + $0x20] sm:$0xff] %vm243_vm0, %v606_v24  ;;  %v1182_v29 = vadd.f32 %v1181_v27, %v1180_v23  ;;  %1242 = vmatmul.mubr.msk.f32.vlgmr.msra.gmra.mxu1 %vm243_vm0, %v678_v25  ;;  %v663_v30 = vadd.f32 %v1661_v1, %v640_v28  ;;  %v650_v23 = vld [vmem:[#allocation2 + $0x60] sm:$0xff]  ;;  %v651_v27 = vld [vmem:[#allocation2 + $0x68] sm:$0xff] }
 0x120   : > { %v1183_v31 = vpop.f32.mrf.mxu0 }
 0x121   : > { %v607_v32 = vadd.f32 %v1182_v29, %v266_v26  ;;  %v679_v33 = vmax.f32 %v663_v30, 0.0  ;;  %v673_v26 = vadd.f32 %v1661_v1, %v650_v23  ;;  %v652_v29 = vld [vmem:[#allocation2 + $0x70] sm:$0xff] }
 0x122   : > { %v1184_v35 = vpop.f32.mrf.mxu0  ;;  %v641_v36 = vld [vmem:[#allocation2 + $0x18] sm:$0xff] }
 0x123   : > { %624 = vst.msk [vmem:[#allocation2 + $0x28] sm:$0xff] %vm243_vm0, %v607_v32  ;;  %v1185_v37 = vadd.f32 %v1184_v35, %v1183_v31  ;;  %1244 = vmatprep.mubr.msk.f32.mxu1 %vm243_vm0, %v679_v33  ;;  %v664_v38 = vadd.f32 %v1661_v1, %v641_v36  ;;  %v674_v31 = vadd.f32 %v1661_v1, %v651_v27  ;;  %v689_v32 = vmax.f32 %v673_v26, 0.0 }
 0x124   : > { %v1186_v39 = vpop.f32.mrf.mxu0  ;;  %v675_v33 = vadd.f32 %v1661_v1, %v652_v29 }
 0x125   : > { %v608_v40 = vadd.f32 %v1185_v37, %v267_v34  ;;  %v680_v41 = vmax.f32 %v664_v38, 0.0  ;;  %v653_v34 = vld [vmem:[#allocation2 + $0x78] sm:$0xff]  ;;  %v690_v35 = vmax.f32 %v674_v31, 0.0 }
 0x126   : > { %v1187_v43 = vpop.f32.mrf.mxu0  ;;  %v642_v44 = vld [vmem:[#allocation2 + $0x20] sm:$0xff]  ;;  %v676_v36 = vadd.f32 %v1661_v1, %v653_v34  ;;  %v691_v37 = vmax.f32 %v675_v33, 0.0 }
 0x127   : > { %625 = vst.msk [vmem:[#allocation2 + $0x30] sm:$0xff] %vm243_vm0, %v608_v40  ;;  %v1188_v45 = vadd.f32 %v1187_v43, %v1186_v39  ;;  %1245 = vmatmul.mubr.msk.f32.gmra.mxu1 %vm243_vm0, %v680_v41  ;;  %v665_v46 = vadd.f32 %v1661_v1, %v642_v44 }
 0x128   : > { %v1189_v47 = vpop.f32.mrf.mxu0  ;;  %v692_v38 = vmax.f32 %v676_v36, 0.0 }
 0x129   : > { %v609_v48 = vadd.f32 %v1188_v45, %v268_v42  ;;  %v681_v49 = vmax.f32 %v665_v46, 0.0 }
 0x12a   : > { %v1190_v51 = vpop.f32.mrf.mxu0  ;;  %v643_v52 = vld [vmem:[#allocation2 + $0x28] sm:$0xff] }
 0x12b   : > { %626 = vst.msk [vmem:[#allocation2 + $0x38] sm:$0xff] %vm243_vm0, %v609_v48  ;;  %v1191_v53 = vadd.f32 %v1190_v51, %v1189_v47  ;;  %1247 = vmatprep.mubr.msk.f32.mxu1 %vm243_vm0, %v681_v49  ;;  %v666_v54 = vadd.f32 %v1661_v1, %v643_v52 }
 0x12c   : > { %v1192_v55 = vpop.f32.mrf.mxu0 }
 0x12d   : > { %v610_v56 = vadd.f32 %v1191_v53, %v269_v50  ;;  %v682_v57 = vmax.f32 %v666_v54, 0.0 }
 0x12e   : > { %v1193_v59 = vpop.f32.mrf.mxu0  ;;  %v644_v60 = vld [vmem:[#allocation2 + $0x30] sm:$0xff] }
 0x12f   : > { %627 = vst.msk [vmem:[#allocation2 + $0x40] sm:$0xff] %vm243_vm0, %v610_v56  ;;  %v1194_v61 = vadd.f32 %v1193_v59, %v1192_v55  ;;  %1248 = vmatmul.mubr.msk.f32.gmra.mxu1 %vm243_vm0, %v682_v57  ;;  %v667_v62 = vadd.f32 %v1661_v1, %v644_v60 }
 0x130   : > { %v1195_v63 = vpop.f32.mrf.mxu0 }
 0x131   : > { %v611_v0 = vadd.f32 %v1194_v61, %v270_v58  ;;  %v683_v2 = vmax.f32 %v667_v62, 0.0 }
 0x132   : > { %v1196_v4 = vpop.f32.mrf.mxu0  ;;  %v645_v5 = vld [vmem:[#allocation2 + $0x38] sm:$0xff] }
 0x133   : > { %628 = vst.msk [vmem:[#allocation2 + $0x48] sm:$0xff] %vm243_vm0, %v611_v0  ;;  %v1197_v6 = vadd.f32 %v1196_v4, %v1195_v63  ;;  %1250 = vmatprep.mubr.msk.f32.mxu1 %vm243_vm0, %v683_v2  ;;  %v668_v7 = vadd.f32 %v1661_v1, %v645_v5 }
 0x134   : > { %v1198_v8 = vpop.f32.mrf.mxu0 }
 0x135   : > { %v612_v9 = vadd.f32 %v1197_v6, %v271_v3  ;;  %v684_v10 = vmax.f32 %v668_v7, 0.0 }
 0x136   : > { %v1199_v12 = vpop.f32.mrf.mxu0  ;;  %v646_v13 = vld [vmem:[#allocation2 + $0x40] sm:$0xff] }
 0x137   : > { %629 = vst.msk [vmem:[#allocation2 + $0x50] sm:$0xff] %vm243_vm0, %v612_v9  ;;  %v1200_v14 = vadd.f32 %v1199_v12, %v1198_v8  ;;  %1251 = vmatmul.mubr.msk.f32.gmra.mxu1 %vm243_vm0, %v684_v10  ;;  %v669_v15 = vadd.f32 %v1661_v1, %v646_v13 }
 0x139   : > { %v613_v16 = vadd.f32 %v1200_v14, %v272_v11  ;;  %v685_v17 = vmax.f32 %v669_v15, 0.0 }
 0x13a   : > { %v647_v18 = vld [vmem:[#allocation2 + $0x48] sm:$0xff] }
 0x13b   : > { %630 = vst.msk [vmem:[#allocation2 + $0x58] sm:$0xff] %vm243_vm0, %v613_v16  ;;  %1253 = vmatprep.mubr.msk.f32.mxu1 %vm243_vm0, %v685_v17  ;;  %v670_v19 = vadd.f32 %v1661_v1, %v647_v18 }
 0x13d   : > { %v686_v20 = vmax.f32 %v670_v19, 0.0 }
 0x13e   : > { %v648_v21 = vld [vmem:[#allocation2 + $0x50] sm:$0xff] }
 0x13f   : > { %1254 = vmatmul.mubr.msk.f32.gmra.mxu1 %vm243_vm0, %v686_v20  ;;  %v671_v22 = vadd.f32 %v1661_v1, %v648_v21 }
 0x141   : > { %v687_v24 = vmax.f32 %v671_v22, 0.0 }
 0x142   : > { %v649_v25 = vld [vmem:[#allocation2 + $0x58] sm:$0xff] }
 0x143   : > { %1256 = vmatprep.mubr.msk.f32.mxu1 %vm243_vm0, %v687_v24  ;;  %v672_v28 = vadd.f32 %v1661_v1, %v649_v25 }
 0x145   : > { %v688_v30 = vmax.f32 %v672_v28, 0.0 }
 0x147   : > { %1257 = vmatmul.mubr.msk.f32.gmra.mxu1 %vm243_vm0, %v688_v30 }
 0x148   : > { %1259 = vmatprep.mubr.msk.f32.mxu1 %vm243_vm0, %v689_v32 }
 0x14b   : > { %1260 = vmatmul.mubr.msk.f32.gmra.mxu1 %vm243_vm0, %v690_v35 }
 0x14c   : > { %1262 = vmatprep.mubr.msk.f32.mxu1 %vm243_vm0, %v691_v37 }
 0x14f   : > { %1263 = vmatmul.mubr.msk.f32.gmra.mxu1 %vm243_vm0, %v692_v38 }
 0x1df   : > { %v1243_v1 = vpop.f32.mrf.mxu1 }
 0x1e0   : > { %v1134_v39 = vpack.c.bf16 %v1243_v1, %v1243_v1 }
 0x1e1   : > { %v811_v40 = vpop.f32.mrf.mxu1 }
 0x1e2   : > { %956 = vst.msk [vmem:[%s1712_s12 + $0x4] sm:$0xf] %vm954_vm1, %v1134_v39  ;;  %v1133_v41 = vpack.c.bf16 %v811_v40, %v811_v40 }
 0x1e4   : > { %955 = vst.msk [vmem:[%s1712_s12] sm:$0xf] %vm954_vm1, %v1133_v41 }
 0x1e7   : > { %v1246_v42 = vpop.f32.mrf.mxu1 }
 0x1e8   : > { %v1136_v43 = vpack.c.bf16 %v1246_v42, %v1246_v42 }
 0x1e9   : > { %v821_v44 = vpop.f32.mrf.mxu1 }
 0x1ea   : > { %958 = vst.msk [vmem:[%s1712_s12 + $0xc] sm:$0xf] %vm954_vm1, %v1136_v43  ;;  %v1135_v45 = vpack.c.bf16 %v821_v44, %v821_v44 }
 0x1ec   : > { %957 = vst.msk [vmem:[%s1712_s12 + $0x8] sm:$0xf] %vm954_vm1, %v1135_v45 }
 0x1ef   : > { %v1249_v46 = vpop.f32.mrf.mxu1 }
 0x1f0   : > { %v1138_v47 = vpack.c.bf16 %v1249_v46, %v1249_v46 }
 0x1f1   : > { %v831_v48 = vpop.f32.mrf.mxu1 }
 0x1f2   : > { %960 = vst.msk [vmem:[%s1712_s12 + $0x14] sm:$0xf] %vm954_vm1, %v1138_v47  ;;  %v1137_v49 = vpack.c.bf16 %v831_v48, %v831_v48 }
 0x1f4   : > { %959 = vst.msk [vmem:[%s1712_s12 + $0x10] sm:$0xf] %vm954_vm1, %v1137_v49 }
 0x1f7   : > { %v1252_v50 = vpop.f32.mrf.mxu1 }
 0x1f8   : > { %v1140_v51 = vpack.c.bf16 %v1252_v50, %v1252_v50 }
 0x1f9   : > { %v841_v52 = vpop.f32.mrf.mxu1 }
 0x1fa   : > { %962 = vst.msk [vmem:[%s1712_s12 + $0x1c] sm:$0xf] %vm954_vm1, %v1140_v51  ;;  %v1139_v53 = vpack.c.bf16 %v841_v52, %v841_v52 }
 0x1fc   : > { %961 = vst.msk [vmem:[%s1712_s12 + $0x18] sm:$0xf] %vm954_vm1, %v1139_v53 }
 0x1ff   : > { %v1255_v54 = vpop.f32.mrf.mxu1 }
 0x200   : > { %v1142_v55 = vpack.c.bf16 %v1255_v54, %v1255_v54 }
 0x201   : > { %v851_v56 = vpop.f32.mrf.mxu1 }
 0x202   : > { %964 = vst.msk [vmem:[%s1712_s12 + $0x24] sm:$0xf] %vm954_vm1, %v1142_v55  ;;  %v1141_v57 = vpack.c.bf16 %v851_v56, %v851_v56 }
 0x204   : > { %963 = vst.msk [vmem:[%s1712_s12 + $0x20] sm:$0xf] %vm954_vm1, %v1141_v57 }
 0x207   : > { %v1258_v58 = vpop.f32.mrf.mxu1 }
 0x208   : > { %v1144_v59 = vpack.c.bf16 %v1258_v58, %v1258_v58 }
 0x209   : > { %v861_v60 = vpop.f32.mrf.mxu1 }
 0x20a   : > { %966 = vst.msk [vmem:[%s1712_s12 + $0x2c] sm:$0xf] %vm954_vm1, %v1144_v59  ;;  %v1143_v61 = vpack.c.bf16 %v861_v60, %v861_v60 }
 0x20b   : > { %v1261_v62 = vpop.f32.mrf.mxu1 }
 0x20c   : > { %965 = vst.msk [vmem:[%s1712_s12 + $0x28] sm:$0xf] %vm954_vm1, %v1143_v61  ;;  %v1146_v63 = vpack.c.bf16 %v1261_v62, %v1261_v62 }
 0x20d   : > { %v871_v0 = vpop.f32.mrf.mxu1 }
 0x20e   : > { %968 = vst.msk [vmem:[%s1712_s12 + $0x34] sm:$0xf] %vm954_vm1, %v1146_v63  ;;  %v1145_v2 = vpack.c.bf16 %v871_v0, %v871_v0 }
 0x20f   : > { %v1264_v3 = vpop.f32.mrf.mxu1 }
 0x210   : > { %967 = vst.msk [vmem:[%s1712_s12 + $0x30] sm:$0xf] %vm954_vm1, %v1145_v2  ;;  %v1148_v4 = vpack.c.bf16 %v1264_v3, %v1264_v3 }
 0x211   : > { %v881_v5 = vpop.f32.mrf.mxu1 }
 0x212   : > { %970 = vst.msk [vmem:[%s1712_s12 + $0x3c] sm:$0xf] %vm954_vm1, %v1148_v4  ;;  %v1147_v6 = vpack.c.bf16 %v881_v5, %v881_v5 }
 0x214   : > { %969 = vst.msk [vmem:[%s1712_s12 + $0x38] sm:$0xf] %vm954_vm1, %v1147_v6 }
 0x215 PF: > { %s17_s20 = sadd.s32 1, %s1457_s20   ;;  %s1772_s15 = smov %s1441_s16 }
 0x216   : > { %p14_p8 = scmp.ge.s32.totalorder %s17_s20, 4   ;;  %s1773_s16 = smov %s1445_s17 }
 0x217   : > { %s1774_s17 = smov %s1537_s27  ;;  %s1775_s18 = smov %s1453_s19 }
 0x218   : > { %s1776_s19 = smov %s1778_s22  ;;  %16 = sbr.rel (!%p14_p8) target bundleno = 4 (0x4), region = 85 }
 0x21d   :  { %993 = vsyncpa [#allocation4], 1 }
 0x21e   :  { %995 = vsyncpa [#allocation4 + $0x1], 1 }

</bundles_post_ra>
